<compile_context>
chip_gen: v5e
topology: v5e:2x2
jax: 0.10.0
libtpu: 0.0.40
codegen_flags: <defaults>
</compile_context>

<pallas_src>
import functools

import jax
import jax.numpy as jnp
from jax.experimental import pallas as pl
from jax.experimental.pallas import tpu as pltpu


def _cdiv(a, b):
    return -(-a // b)


def _round_up(x, m):
    return _cdiv(x, m) * m


def _largest_divisor_leq(n, cap):
    cap = max(1, min(cap, n))
    for g in range(cap, 0, -1):
        if n % g == 0:
            return g
    return 1


def _vmem_budget():
    """Generation-aware VMEM working-set budget + Mosaic scoped limit."""
    try:
        cap = int(pltpu.get_tpu_info().vmem_capacity_bytes)   # 128 MiB v5e/v6e, 64 MiB v7x
    except Exception:
        cap = 64 * 1024 * 1024                                # conservative fallback
    budget = min(int(cap * 0.45), 48 * 1024 * 1024)           # double-buffered blocks
    limit = min(int(cap * 0.75), 96 * 1024 * 1024)            # Mosaic scoped VMEM limit
    return budget, limit


# ---------------- kernel 1: conv GEMM + per-tile BN statistics ----------------
def conv_stats_kernel(w_ref, p_ref, y_ref, sum_ref, m2_ref, *, m_total, tm):
    # w_ref: (Cout_pad, K) bf16   p_ref: (K, TM) bf16   y_ref: (Cout_pad, TM) f32
    # sum_ref / m2_ref: (1, Cout_pad, 1) -- per-tile channel sum / centered M2.
    y = jnp.dot(w_ref[...], p_ref[...], preferred_element_type=jnp.float32)
    y_ref[...] = y

    i = pl.program_id(0)
    n_valid = jnp.minimum(jnp.maximum(m_total - i * tm, 0), tm)
    nf = jnp.maximum(n_valid.astype(jnp.float32), 1.0)

    # Padded columns (and padded channel rows) of the bias-free GEMM are exactly
    # zero, so the plain sum is exact; the centered square needs a column mask.
    s = jnp.sum(y, axis=1, keepdims=True)                    # (Cout_pad, 1)
    mu = s / nf                                              # per-tile channel mean
    col = jax.lax.broadcasted_iota(jnp.int32, y.shape, 1)
    d = y - mu
    m2 = jnp.sum(jnp.where(col < n_valid, d * d, 0.0), axis=1, keepdims=True)

    sum_ref[...] = s[None]                                   # (1, Cout_pad, 1)
    m2_ref[...] = m2[None]


# ---------------- kernel 2: fused BatchNorm affine + ReLU ---------------------
def bn_relu_kernel(scale_ref, shift_ref, y_ref, o_ref):
    # scale/shift: (Cout_pad, 1) broadcast over lanes; y/o: (Cout_pad, TM).
    o_ref[...] = jnp.maximum(y_ref[...] * scale_ref[...] + shift_ref[...], 0.0)


@functools.partial(jax.jit, static_argnames=("stride", "padding"))
def conv_module_forward(x, weight, bias, gamma, beta,
                        *, stride=2, padding=1, eps=1e-5):
    """x: (N, Cin, H, W) float32 NCHW.  Returns (N, Cout, OH, OW).

    `bias` is accepted for API parity with nn.Conv2d but unused in the hot
    path: training-mode BatchNorm's mean subtraction cancels it exactly.
    """
    del bias
    N, Cin, H, W = x.shape
    Cout, _, KH, KW = weight.shape
    OH = (H + 2 * padding - KH) // stride + 1
    OW = (W + 2 * padding - KW) // stride + 1
    K = Cin * KH * KW
    M = N * OH * OW

    cout_pad = _round_up(Cout, 8)
    m128 = _round_up(M, 128)

    budget, vmem_limit = _vmem_budget()
    usable = max(budget - 2 * 1024 * 1024, 2 * 1024 * 1024)

    # ----- tile sizing (pass 1): bf16 (K,tm) patches + f32 (Cout_pad,tm) y ----
    per_col1 = 2 * 2 * K + 4 * 2 * cout_pad          # double-buffered bytes/lane col
    per_col2 = 4 * 2 * cout_pad * 2                  # pass-2 y-in + out, f32, x2
    tm = max(128, min(32768, (usable // max(per_col1, per_col2)) // 128 * 128))
    tm = min(tm, m128)
    n_tiles = _cdiv(m128, tm)
    # v7x megacore: keep >=4 parallel tiles when there is enough work.
    n_tiles = max(n_tiles, min(4, m128 // 512), 1)
    tm = _round_up(_cdiv(m128, n_tiles), 128)        # near-divisor of m128
    n_tiles = _cdiv(m128, tm)
    m_pad = n_tiles * tm

    # ----- glue: im2col directly in (K, M) layout (lane axis = M), bf16 -------
    # TODO(synk): replace this XLA-materialized patch matrix with a streaming
    # implicit GEMM fed from the padded input inside the kernel.
    xb = x.astype(jnp.bfloat16)
    xp = jnp.pad(xb, ((0, 0), (0, 0), (padding, padding), (padding, padding)))
    cols = []
    for kh in range(KH):
        for kw in range(KW):
            cols.append(xp[:, :, kh:kh + stride * OH:stride,
                               kw:kw + stride * OW:stride])   # (N, Cin, OH, OW)
    patches = jnp.stack(cols, axis=0)                 # (KH*KW, N, Cin, OH, OW)
    patches = patches.transpose(2, 0, 1, 3, 4).reshape(K, M)
    patches = jnp.pad(patches, ((0, 0), (0, m_pad - M)))

    w_t = weight.reshape(Cout, K).astype(jnp.bfloat16)         # OIHW -> (Cout, K)
    w_t = jnp.pad(w_t, ((0, cout_pad - Cout), (0, 0)))         # (Cout_pad, K)

    params = pltpu.CompilerParams(
        dimension_semantics=("parallel",),
        vmem_limit_bytes=vmem_limit)

    # ----- pass 1: tiled GEMM + per-tile channel statistics -------------------
    kernel1 = functools.partial(conv_stats_kernel, m_total=M, tm=tm)
    y, tile_sum, tile_m2 = pl.pallas_call(
        kernel1,
        out_shape=(jax.ShapeDtypeStruct((cout_pad, m_pad), jnp.float32),
                   jax.ShapeDtypeStruct((n_tiles, cout_pad, 1), jnp.float32),
                   jax.ShapeDtypeStruct((n_tiles, cout_pad, 1), jnp.float32)),
        grid=(n_tiles,),
        in_specs=[pl.BlockSpec((cout_pad, K), lambda i: (0, 0)),
                  pl.BlockSpec((K, tm), lambda i: (0, i))],
        out_specs=(pl.BlockSpec((cout_pad, tm), lambda i: (0, i)),
                   pl.BlockSpec((1, cout_pad, 1), lambda i: (i, 0, 0)),
                   pl.BlockSpec((1, cout_pad, 1), lambda i: (i, 0, 0))),
        compiler_params=params,
        cost_estimate=pl.CostEstimate(
            flops=2 * m_pad * K * cout_pad,
            transcendentals=0,
            bytes_accessed=2 * (K * m_pad + cout_pad * K)
                           + 4 * (cout_pad * m_pad + 2 * n_tiles * cout_pad)),
    )(w_t, patches)

    # ----- tiny JAX reduce: Chan's parallel variance -> fused scale/shift -----
    counts = jnp.clip(M - jnp.arange(n_tiles, dtype=jnp.int32) * tm,
                      0, tm).astype(jnp.float32)               # valid cols / tile
    sums = tile_sum[:, :, 0]                                   # (n_tiles, Cout_pad)
    m2s = tile_m2[:, :, 0]
    total = jnp.sum(sums, axis=0)
    mean = total / M                                           # true row count
    mu_i = sums / jnp.maximum(counts, 1.0)[:, None]
    m2_tot = jnp.sum(m2s, axis=0) + jnp.sum(
        counts[:, None] * jnp.square(mu_i - mean[None, :]), axis=0)
    var = jnp.maximum(m2_tot / M, 0.0)                         # biased variance

    gamma_p = jnp.pad(gamma.astype(jnp.float32), (0, cout_pad - Cout))
    beta_p = jnp.pad(beta.astype(jnp.float32), (0, cout_pad - Cout))
    scale = gamma_p * jax.lax.rsqrt(var + eps)
    shift = beta_p - mean * scale
    scale = scale.reshape(cout_pad, 1)
    shift = shift.reshape(cout_pad, 1)

    # ----- pass 2 tile: own (larger) tile, exact multiple of the pass-1 tile --
    tm2_cap = max(128, min(65536, (usable // per_col2) // 128 * 128))
    g_cap = max(1, tm2_cap // tm)
    if n_tiles >= 4:
        g_cap = min(g_cap, max(1, n_tiles // 4))   # keep >=4 tiles for v7x megacore
    g = _largest_divisor_leq(n_tiles, g_cap)
    tm2 = g * tm
    n_tiles2 = n_tiles // g

    # ----- pass 2: fused BN affine + ReLU, written in place over y ------------
    out2 = pl.pallas_call(
        bn_relu_kernel,
        out_shape=jax.ShapeDtypeStruct((cout_pad, m_pad), jnp.float32),
        grid=(n_tiles2,),
        in_specs=[pl.BlockSpec((cout_pad, 1), lambda i: (0, 0)),
                  pl.BlockSpec((cout_pad, 1), lambda i: (0, 0)),
                  pl.BlockSpec((cout_pad, tm2), lambda i: (0, i))],
        out_specs=pl.BlockSpec((cout_pad, tm2), lambda i: (0, i)),
        input_output_aliases={2: 0},              # reuse y's HBM buffer in place
        compiler_params=params,
        cost_estimate=pl.CostEstimate(
            flops=2 * cout_pad * m_pad,
            transcendentals=0,
            bytes_accessed=4 * 2 * cout_pad * m_pad),
    )(scale, shift, y)

    # ----- glue: back to NCHW (fused by XLA with the slice) -------------------
    out = out2[:Cout, :M].reshape(Cout, N, OH, OW).transpose(1, 0, 2, 3)
    return out


def reference_forward(x, weight, bias, gamma, beta,
                      *, stride=2, padding=1, eps=1e-5):
    """Pure-JAX reference mirroring nn.Sequential(Conv2d, BatchNorm2d(train), ReLU)."""
    y = jax.lax.conv_general_dilated(
        x, weight, window_strides=(stride, stride),
        padding=[(padding, padding), (padding, padding)],
        dimension_numbers=("NCHW", "OIHW", "NCHW"),
        precision=jax.lax.Precision.HIGHEST)
    y = y + bias[None, :, None, None]
    mean = jnp.mean(y, axis=(0, 2, 3), keepdims=True)
    var = jnp.mean(jnp.square(y - mean), axis=(0, 2, 3), keepdims=True)
    y = (y - mean) * jax.lax.rsqrt(var + eps)
    y = y * gamma[None, :, None, None] + beta[None, :, None, None]
    return jnp.maximum(y, 0.0)


if __name__ == "__main__":
    # Small deterministic setup: in_channels=4, out_channels=8, 16x16 input.
    N, Cin, H, W = 2, 4, 16, 16
    Cout, KH, KW = 8, 4, 4

    key = jax.random.PRNGKey(0)
    kx, kwt, kb, kg, kbeta = jax.random.split(key, 5)
    x = jax.random.normal(kx, (N, Cin, H, W), dtype=jnp.float32)
    weight = 0.1 * jax.random.normal(kwt, (Cout, Cin, KH, KW), dtype=jnp.float32)
    bias = 0.1 * jax.random.normal(kb, (Cout,), dtype=jnp.float32)
    gamma = 1.0 + 0.1 * jax.random.normal(kg, (Cout,), dtype=jnp.float32)
    beta = 0.1 * jax.random.normal(kbeta, (Cout,), dtype=jnp.float32)

    out = conv_module_forward(x, weight, bias, gamma, beta)
    out = jax.block_until_ready(out)
    assert out.shape == (N, Cout, H // 2, W // 2), out.shape

    # Kernel-exactness check: reference conv on the same bf16-rounded inputs the
    # MXU sees (bf16 products are exact; only f32 accumulation order differs).
    xb = x.astype(jnp.bfloat16).astype(jnp.float32)
    wb = weight.astype(jnp.bfloat16).astype(jnp.float32)
    ref_bf16 = reference_forward(xb, wb, bias, gamma, beta)
    err_bf16 = float(jnp.max(jnp.abs(out - ref_bf16)))
    assert jnp.allclose(out, ref_bf16, atol=2e-3, rtol=2e-3), err_bf16

    # End-to-end sanity vs. full-f32 math: the bf16 MXU inputs (per perf review)
    # cost ~O(sqrt(K) * eps_bf16) relative error on the normalized outputs.
    ref_f32 = reference_forward(x, weight, bias, gamma, beta)
    err_f32 = float(jnp.max(jnp.abs(out - ref_f32)))
    assert jnp.allclose(out, ref_f32, atol=3e-2, rtol=3e-2), err_f32

    print("KERNEL_OK")
</pallas_src>

<mosaic_0001>
module attributes {stable_mosaic.version = 11 : i64} {
  func.func @conv_stats_kernel(%arg0: i32, %arg1: memref<8x64xbf16, #tpu.memory_space<vmem>>, %arg2: memref<64x128xbf16, #tpu.memory_space<vmem>>, %arg3: memref<8x128xf32, #tpu.memory_space<vmem>>, %arg4: memref<1x8x1xf32, #tpu.memory_space<vmem>>, %arg5: memref<1x8x1xf32, #tpu.memory_space<vmem>>) attributes {dimension_semantics = [#tpu.dimension_semantics<parallel>], iteration_bounds = array<i64: 1>, scalar_prefetch = 0 : i64, scratch_operands = 0 : i64, tpu.core_type = #tpu.core_type<tc>, window_params = [{pipeline_mode = #tpu.pipeline_mode<synchronous>, transform_indices = @transform_0, window_bounds = array<i64: 8, 64>}, {transform_indices = @transform_1, window_bounds = array<i64: 64, 128>}, {transform_indices = @transform_2, window_bounds = array<i64: 8, 128>}, {transform_indices = @transform_3, window_bounds = array<i64: 1, 8, 1>}, {transform_indices = @transform_4, window_bounds = array<i64: 1, 8, 1>}]} {
    %c0 = arith.constant 0 : index
    %c0_0 = arith.constant 0 : index
    %0 = vector.load %arg1[%c0, %c0_0] : memref<8x64xbf16, #tpu.memory_space<vmem>>, vector<8x64xbf16>
    %c0_1 = arith.constant 0 : index
    %c0_2 = arith.constant 0 : index
    %1 = vector.load %arg2[%c0_1, %c0_2] : memref<64x128xbf16, #tpu.memory_space<vmem>>, vector<64x128xbf16>
    %cst = arith.constant dense<0.000000e+00> : vector<8x128xf32>
    %2 = tpu.matmul %0, %1, %cst {dimension_numbers = #tpu.dot_dimension_numbers<[1], [0], [0], [1], [0, 0, 1, 1], [], []>} : vector<8x64xbf16>, vector<64x128xbf16>, vector<8x128xf32> -> vector<8x128xf32>
    %c0_3 = arith.constant 0 : index
    %c0_4 = arith.constant 0 : index
    %3 = vector.load %arg3[%c0_3, %c0_4] : memref<8x128xf32, #tpu.memory_space<vmem>>, vector<8x128xf32>
    tpu.vector_store %arg3[%c0_3, %c0_4], %2 {strides = array<i32>} : memref<8x128xf32, #tpu.memory_space<vmem>>, vector<8x128xf32>,
    %c128_i32 = arith.constant 128 : i32
    %4 = arith.muli %arg0, %c128_i32 : i32
    %c128_i32_5 = arith.constant 128 : i32
    %5 = arith.subi %c128_i32_5, %4 : i32
    %c0_i32 = arith.constant 0 : i32
    %6 = arith.maxsi %5, %c0_i32 : i32
    %c128_i32_6 = arith.constant 128 : i32
    %7 = arith.minsi %6, %c128_i32_6 : i32
    %8 = arith.sitofp %7 : i32 to f32
    %cst_7 = arith.constant 1.000000e+00 : f32
    %9 = arith.maximumf %8, %cst_7 : f32
    %cst_8 = arith.constant dense<0.000000e+00> : vector<8xf32>
    %10 = vector.multi_reduction <add>, %2, %cst_8 [1] : vector<8x128xf32> to vector<8xf32>
    %11 = vector.shape_cast %10 : vector<8xf32> to vector<8x1xf32>
    %12 = vector.broadcast %9 : f32 to vector<8x1xf32>
    %13 = arith.divf %11, %12 : vector<8x1xf32>
    %14 = tpu.iota {dimensions = array<i32: 1>} : vector<8x128xi32>
    %15 = vector.broadcast %13 : vector<8x1xf32> to vector<8x128xf32>
    %16 = arith.subf %2, %15 : vector<8x128xf32>
    %17 = vector.broadcast %7 : i32 to vector<8x128xi32>
    %18 = arith.cmpi slt, %14, %17 : vector<8x128xi32>
    %19 = arith.mulf %16, %16 : vector<8x128xf32>
    %cst_9 = arith.constant 0.000000e+00 : f32
    %20 = vector.broadcast %cst_9 : f32 to vector<8x128xf32>
    %21 = arith.select %18, %19, %20 : vector<8x128xi1>, vector<8x128xf32>
    %cst_10 = arith.constant dense<0.000000e+00> : vector<8xf32>
    %22 = vector.multi_reduction <add>, %21, %cst_10 [1] : vector<8x128xf32> to vector<8xf32>
    %23 = vector.shape_cast %22 : vector<8xf32> to vector<8x1xf32>
    %24 = vector.shape_cast %11 : vector<8x1xf32> to vector<1x8x1xf32>
    %c0_11 = arith.constant 0 : index
    %c0_12 = arith.constant 0 : index
    %c0_13 = arith.constant 0 : index
    %25 = vector.load %arg4[%c0_11, %c0_12, %c0_13] : memref<1x8x1xf32, #tpu.memory_space<vmem>>, vector<1x8x1xf32>
    tpu.vector_store %arg4[%c0_11, %c0_12, %c0_13], %24 {strides = array<i32>} : memref<1x8x1xf32, #tpu.memory_space<vmem>>, vector<1x8x1xf32>,
    %26 = vector.shape_cast %23 : vector<8x1xf32> to vector<1x8x1xf32>
    %c0_14 = arith.constant 0 : index
    %c0_15 = arith.constant 0 : index
    %c0_16 = arith.constant 0 : index
    %27 = vector.load %arg5[%c0_14, %c0_15, %c0_16] : memref<1x8x1xf32, #tpu.memory_space<vmem>>, vector<1x8x1xf32>
    tpu.vector_store %arg5[%c0_14, %c0_15, %c0_16], %26 {strides = array<i32>} : memref<1x8x1xf32, #tpu.memory_space<vmem>>, vector<1x8x1xf32>,
    return
  }
  func.func @transform_0(%arg0: i32) -> (i32, i32) {
    %c0_i32 = arith.constant 0 : i32
    %c0_i32_0 = arith.constant 0 : i32
    %c0_i32_1 = arith.constant 0 : i32
    return %c0_i32, %c0_i32_0 : i32, i32
  }
  func.func @transform_1(%arg0: i32) -> (i32, i32) {
    %c0_i32 = arith.constant 0 : i32
    %c0_i32_0 = arith.constant 0 : i32
    return %c0_i32, %arg0 : i32, i32
  }
  func.func @transform_2(%arg0: i32) -> (i32, i32) {
    %c0_i32 = arith.constant 0 : i32
    %c0_i32_0 = arith.constant 0 : i32
    return %c0_i32, %arg0 : i32, i32
  }
  func.func @transform_3(%arg0: i32) -> (i32, i32, i32) {
    %c0_i32 = arith.constant 0 : i32
    %c0_i32_0 = arith.constant 0 : i32
    %c0_i32_1 = arith.constant 0 : i32
    return %arg0, %c0_i32, %c0_i32_0 : i32, i32, i32
  }
  func.func @transform_4(%arg0: i32) -> (i32, i32, i32) {
    %c0_i32 = arith.constant 0 : i32
    %c0_i32_0 = arith.constant 0 : i32
    %c0_i32_1 = arith.constant 0 : i32
    return %arg0, %c0_i32, %c0_i32_0 : i32, i32, i32
  }
}

module attributes {stable_mosaic.version = 11 : i64} {
  func.func @bn_relu_kernel(%arg0: i32, %arg1: memref<8x1xf32, #tpu.memory_space<vmem>>, %arg2: memref<8x1xf32, #tpu.memory_space<vmem>>, %arg3: memref<8x128xf32, #tpu.memory_space<vmem>>, %arg4: memref<8x128xf32, #tpu.memory_space<vmem>>) attributes {dimension_semantics = [#tpu.dimension_semantics<parallel>], iteration_bounds = array<i64: 1>, scalar_prefetch = 0 : i64, scratch_operands = 0 : i64, tpu.core_type = #tpu.core_type<tc>, window_params = [{pipeline_mode = #tpu.pipeline_mode<synchronous>, transform_indices = @transform_0, window_bounds = array<i64: 8, 1>}, {pipeline_mode = #tpu.pipeline_mode<synchronous>, transform_indices = @transform_1, window_bounds = array<i64: 8, 1>}, {transform_indices = @transform_2, window_bounds = array<i64: 8, 128>}, {transform_indices = @transform_3, window_bounds = array<i64: 8, 128>}]} {
    %c0 = arith.constant 0 : index
    %c0_0 = arith.constant 0 : index
    %0 = vector.load %arg3[%c0, %c0_0] : memref<8x128xf32, #tpu.memory_space<vmem>>, vector<8x128xf32>
    %c0_1 = arith.constant 0 : index
    %c0_2 = arith.constant 0 : index
    %1 = vector.load %arg1[%c0_1, %c0_2] : memref<8x1xf32, #tpu.memory_space<vmem>>, vector<8x1xf32>
    %2 = vector.broadcast %1 : vector<8x1xf32> to vector<8x128xf32>
    %3 = arith.mulf %0, %2 : vector<8x128xf32>
    %c0_3 = arith.constant 0 : index
    %c0_4 = arith.constant 0 : index
    %4 = vector.load %arg2[%c0_3, %c0_4] : memref<8x1xf32, #tpu.memory_space<vmem>>, vector<8x1xf32>
    %5 = vector.broadcast %4 : vector<8x1xf32> to vector<8x128xf32>
    %6 = arith.addf %3, %5 : vector<8x128xf32>
    %cst = arith.constant 0.000000e+00 : f32
    %7 = vector.broadcast %cst : f32 to vector<8x128xf32>
    %8 = arith.maximumf %6, %7 : vector<8x128xf32>
    %c0_5 = arith.constant 0 : index
    %c0_6 = arith.constant 0 : index
    %9 = vector.load %arg4[%c0_5, %c0_6] : memref<8x128xf32, #tpu.memory_space<vmem>>, vector<8x128xf32>
    tpu.vector_store %arg4[%c0_5, %c0_6], %8 {strides = array<i32>} : memref<8x128xf32, #tpu.memory_space<vmem>>, vector<8x128xf32>,
    return
  }
  func.func @transform_0(%arg0: i32) -> (i32, i32) {
    %c0_i32 = arith.constant 0 : i32
    %c0_i32_0 = arith.constant 0 : i32
    %c0_i32_1 = arith.constant 0 : i32
    return %c0_i32, %c0_i32_0 : i32, i32
  }
  func.func @transform_1(%arg0: i32) -> (i32, i32) {
    %c0_i32 = arith.constant 0 : i32
    %c0_i32_0 = arith.constant 0 : i32
    %c0_i32_1 = arith.constant 0 : i32
    return %c0_i32, %c0_i32_0 : i32, i32
  }
  func.func @transform_2(%arg0: i32) -> (i32, i32) {
    %c0_i32 = arith.constant 0 : i32
    %c0_i32_0 = arith.constant 0 : i32
    return %c0_i32, %arg0 : i32, i32
  }
  func.func @transform_3(%arg0: i32) -> (i32, i32) {
    %c0_i32 = arith.constant 0 : i32
    %c0_i32_0 = arith.constant 0 : i32
    return %c0_i32, %arg0 : i32, i32
  }
}

</mosaic_0001>

<bundles_post_ra>
// kernel: conv_module_forward.3
= control target key start
LH: loop header
LB: loop body
LE: loop exit
PB: predicated region body
PF: predicated region fallthrough
CT: control target
= control target key end

     0   :  { %v37_v0 = vmov 0   ;;  %s70_s0 = inlined_call_operand.vmem [shape: f32[8,1], index: 0, kind: input, shape index: {}]   ;;  %s71_s1 = inlined_call_operand.vmem [shape: f32[8,1], index: 1, kind: input, shape index: {}]   ;;  %s72_s2 = inlined_call_operand.vmem [shape: f32[8,128], index: 2, kind: input, shape index: {}, may-alias: {2,3}]   ;;  %s73_s3 = inlined_call_operand.vmem [shape: f32[8,128], index: 3, kind: output, shape index: {}, may-alias: {2,3}]  }
   0x1   :  { %36 = vset.pattern.permute.xlu0 %v37_v0  ;;  %v15_v1 = vld [vmem:[%s70_s0] sm:$0xff] }
   0x2   :  { %18 = vperm.xlu0 %36, %v15_v1   ;;  %v22_v2 = vld [vmem:[%s71_s1] sm:$0xff] }
   0x3   :  { %v14_v4 = vld [vmem:[%s72_s2] sm:$0xff] }
   0xa   :  { %25 = vperm.xlu0 %36, %v22_v2  }
  0x74   :  { %v19_v3 = vpop.permute.xlu0 %18 }
  0x75   :  { %v21_v5 = vmul.f32 %v19_v3, %v14_v4 }
  0x7c   :  { %v26_v6 = vpop.permute.xlu0 %25 }
  0x7d   :  { %v28_v7 = vadd.f32 %v26_v6, %v21_v5 }
  0x7f   :  { %v29_v8 = vmax.f32 %v28_v7, 0.0 }
  0x81   :  { %30 = vst [vmem:[%s73_s3] sm:$0xff] %v29_v8 }

// kernel: conv_module_forward.2
= control target key start
LH: loop header
LB: loop body
LE: loop exit
PB: predicated region body
PF: predicated region fallthrough
CT: control target
= control target key end

     0   :  { %vm48_vm0 = vcmask 523264   ;;  %v140_v7 = vmov 128.0   ;;  %vm101_vm2 = vcmask 7168   ;;  %s190_s1 = inlined_call_operand.vmem [shape: bf16[64,128], index: 1, kind: input, shape index: {}]   ;;  %s191_s0 = inlined_call_operand.vmem [shape: bf16[8,64], index: 0, kind: input, shape index: {}]   ;;  %s192_s2 = inlined_call_operand.vmem [shape: f32[8,128], index: 2, kind: output, shape index: {0}]   ;;  %s193_s3 = inlined_call_operand.vmem [shape: f32[1,8,1], index: 3, kind: output, shape index: {1}]   ;;  %s194_s4 = inlined_call_operand.vmem [shape: f32[1,8,1], index: 4, kind: output, shape index: {2}]  }
   0x1   :  { %v136_v0 = vld [vmem:[%s190_s1 + $0x18] sm:$0xff]  ;;  %v135_v1 = vld [vmem:[%s190_s1 + $0x10] sm:$0xff]  ;;  %v134_v2 = vld [vmem:[%s190_s1 + $0x8] sm:$0xff]  ;;  %138 = vrcp.f32 %v140_v7 }
   0x2   :  { %56 = vmatpush.bf16.msra.mxu0 %v136_v0  ;;  %v133_v3 = vld [vmem:[%s190_s1] sm:$0xff] }
   0x3   :  { %v15_v4 = vld [vmem:[%s191_s0] sm:$0xf] }
   0x6   :  { %57 = vmatpush.bf16.msra.mxu0 %v135_v1 }
   0x7   :  { %v139_v8 = vpop.eup %138 }
   0x8   :  { %v78_v9 = vmul.f32 128.0, %v139_v8  ;;  %vm83_vm1 = vweird.f32 %v139_v8 }
   0xa   :  { %58 = vmatpush.bf16.msra.mxu0 %v134_v2  ;;  %v79_v10 = vsub.f32 1.0, %v78_v9 }
   0xc   :  { %v80_v11 = vmul.f32 %v139_v8, %v79_v10 }
   0xe   :  { %59 = vmatpush.bf16.msra.mxu0 %v133_v3  ;;  %v81_v12 = vadd.f32 %v139_v8, %v80_v11 }
  0x10   :  { %v85_v13 = vsel %vm83_vm1, %v139_v8, %v81_v12 }
  0x11   :  { %132 = vmatmul.msk.bf16.vlgmr.msra.gmra.mxu0 %vm48_vm0, %v15_v4 }
  0x8e   :  { %v61_v5 = vpop.f32.mrf.mxu0 }
  0x8f   :  { %65 = vst [vmem:[%s192_s2] sm:$0xff] %v61_v5  ;;  %74 = vadd.xlane.f32.xlu0 %v61_v5 }
  0x96   :  { %v63_v6 = vpop.f32.mrf.mxu0 }
 0x102   :  { %v75_v14 = vpop.xlane.xlu0 %74 }
 0x103   :  { %v91_v15 = vmul.f32 %v85_v13, %v75_v14  ;;  %102 = vst.msk [vmem:[%s193_s3] sm:$0xff] %vm101_vm2, %v75_v14 }
 0x105   :  { %v94_v16 = vsub.f32 %v61_v5, %v91_v15 }
 0x107   :  { %v97_v17 = vmul.f32 %v94_v16, %v94_v16 }
 0x109   :  { %99 = vadd.xlane.f32.xlu0 %v97_v17 }
 0x17c   :  { %v100_v18 = vpop.xlane.xlu0 %99 }
 0x17d   :  { %103 = vst.msk [vmem:[%s194_s4] sm:$0xff] %vm101_vm2, %v100_v18 }

</bundles_post_ra>
